<compile_context>
chip_gen: v5e
topology: v5e:2x2
jax: 0.10.0
libtpu: 0.0.40
codegen_flags: <defaults>
</compile_context>

<pallas_src>
from functools import partial

import jax
import jax.numpy as jnp
from jax import lax
from jax.experimental import pallas as pl
from jax.experimental.pallas import tpu as pltpu

STATE_DIM = 6     # env.observation_space.shape[0] for HIVPatient
N_ACTION = 4      # env.action_space.n for HIVPatient
HIDDEN = 128
A_PAD = 8         # action rows padded to the f32 sublane tile (rows 4..7 inert)


def _policy_kernel(x_ref, w1_ref, b1_ref, w2_ref, b2_ref, out_ref):
    # x_ref:  [TB, STATE_DIM]   batch rows on sublanes, features on lanes
    # w1_ref: [HIDDEN, STATE_DIM]     b1_ref: [HIDDEN, 1]
    # w2_ref: [A_PAD, HIDDEN]         b2_ref: [A_PAD, 1]  (pad rows: w2=0, b2=-1e30)
    # out_ref:[A_PAD, TB]       lane-dense probabilities, batch on lanes
    x = x_ref[...]                                               # f32 [TB, S]

    # fc1: contract the feature axis of both operands (q@k^T pattern) so the
    # result lands as [HIDDEN, TB] with batch on lanes.  MXU, f32 accumulate.
    h = lax.dot_general(w1_ref[...], x,
                        dimension_numbers=(((1,), (1,)), ((), ())),
                        preferred_element_type=jnp.float32)      # [H, TB]
    h = jnp.maximum(h + b1_ref[...], 0.0)                        # bias + ReLU

    # fc2: native [A_PAD, H] @ [H, TB] matmul.
    s = jnp.dot(w2_ref[...], h,
                preferred_element_type=jnp.float32) + b2_ref[...]  # [A_PAD, TB]

    # Numerically stable softmax over the action (sublane) axis.  Padded
    # action rows carry score -1e30 -> exp ~ 0 -> they do not perturb the
    # max or the denominator.  Exact normalization (no approx reciprocal).
    m = jnp.max(s, axis=0, keepdims=True)                        # [1, TB]
    e = jnp.exp(s - m)                                           # [A_PAD, TB]
    denom = jnp.sum(e, axis=0, keepdims=True)                    # [1, TB]
    out_ref[...] = e / denom


def _round_up(n, m):
    return ((n + m - 1) // m) * m


@partial(jax.jit, static_argnames=("block_b",))
def policy_forward(x, w1, b1, w2, b2, *, block_b=8192):
    """Pallas equivalent of policyNetwork.forward -> [B, N_ACTION] probabilities.

    Weights are in PyTorch layout: w1 [HIDDEN, STATE_DIM], w2 [N_ACTION, HIDDEN].
    """
    if x.ndim == 1:                        # mirror torch's unsqueeze(dim=0)
        x = x[None, :]
    x = x.astype(jnp.float32)              # mirrors .to(torch.float32)
    B = x.shape[0]

    # Batch tile: multiple of 128, capped by block_b (forced to a 128-multiple,
    # review correctness concern), and small enough that the grid has >= 2
    # steps when B allows it (so v7x's two TensorCores both get work).
    cap = max(128, (block_b // 128) * 128)
    tb = min(cap, _round_up(pl.cdiv(B, 2), 128))
    grid_b = pl.cdiv(B, tb)                # partial last block handled by masking

    # Tiny weight prep (constant-folded / fused under jit; ~KBs).
    w1f = w1.astype(jnp.float32)
    b1c = b1.astype(jnp.float32).reshape(HIDDEN, 1)
    w2p = jnp.zeros((A_PAD, HIDDEN), jnp.float32).at[:N_ACTION].set(
        w2.astype(jnp.float32))
    b2p = jnp.full((A_PAD, 1), -1e30, jnp.float32).at[:N_ACTION, 0].set(
        b2.astype(jnp.float32))

    out = pl.pallas_call(
        _policy_kernel,
        out_shape=jax.ShapeDtypeStruct((A_PAD, B), jnp.float32),
        grid=(grid_b,),
        in_specs=[
            pl.BlockSpec((tb, STATE_DIM), lambda i: (i, 0)),      # x: step over rows
            pl.BlockSpec((HIDDEN, STATE_DIM), lambda i: (0, 0)),  # resident weights
            pl.BlockSpec((HIDDEN, 1), lambda i: (0, 0)),
            pl.BlockSpec((A_PAD, HIDDEN), lambda i: (0, 0)),
            pl.BlockSpec((A_PAD, 1), lambda i: (0, 0)),
        ],
        out_specs=pl.BlockSpec((A_PAD, tb), lambda i: (0, i)),    # lane-dense output
        compiler_params=pltpu.CompilerParams(
            dimension_semantics=("parallel",)),
    )(x, w1f, b1c, w2p, b2p)

    # Drop the inert padded action rows; one tiny transpose back to [B, A].
    return out[:N_ACTION, :].T


def init_params(key):
    """Deterministic init (PyTorch-Linear-style uniform fan-in bounds),
    stored in PyTorch layout [out_features, in_features]."""
    k1, k2, k3, k4 = jax.random.split(key, 4)
    bound1 = 1.0 / (STATE_DIM ** 0.5)
    bound2 = 1.0 / (HIDDEN ** 0.5)
    w1 = jax.random.uniform(k1, (HIDDEN, STATE_DIM), jnp.float32, -bound1, bound1)
    b1 = jax.random.uniform(k2, (HIDDEN,), jnp.float32, -bound1, bound1)
    w2 = jax.random.uniform(k3, (N_ACTION, HIDDEN), jnp.float32, -bound2, bound2)
    b2 = jax.random.uniform(k4, (N_ACTION,), jnp.float32, -bound2, bound2)
    return w1, b1, w2, b2


if __name__ == "__main__":
    key = jax.random.PRNGKey(0)
    kx, kx2, kp = jax.random.split(key, 3)
    w1, b1, w2, b2 = init_params(kp)

    def ref(xv):
        h = jnp.maximum(xv @ w1.T + b1, 0.0)
        return jax.nn.softmax(h @ w2.T + b2, axis=1)

    # Small batch (mirrors per-env-step usage).
    x_small = jax.random.normal(kx, (2, STATE_DIM), jnp.float32)
    probs = jax.block_until_ready(policy_forward(x_small, w1, b1, w2, b2))
    assert probs.shape == (2, N_ACTION)
    assert jnp.allclose(jnp.sum(probs, axis=1), 1.0, atol=1e-3)
    assert jnp.allclose(probs, ref(x_small), atol=2e-3)

    # 1-D state input mirrors torch's unsqueeze path.
    probs1 = jax.block_until_ready(policy_forward(x_small[0], w1, b1, w2, b2))
    assert probs1.shape == (1, N_ACTION)
    assert jnp.allclose(probs1, probs[:1], atol=2e-3)

    # Larger, non-tile-multiple batch: exercises a multi-step grid and
    # boundary masking of the final partial block.
    x_big = jax.random.normal(kx2, (260, STATE_DIM), jnp.float32)
    probs_big = jax.block_until_ready(
        policy_forward(x_big, w1, b1, w2, b2, block_b=256))
    assert probs_big.shape == (260, N_ACTION)
    assert jnp.allclose(jnp.sum(probs_big, axis=1), 1.0, atol=1e-3)
    assert jnp.allclose(probs_big, ref(x_big), atol=2e-3)

    print("KERNEL_OK")
</pallas_src>

<mosaic_0001>
module attributes {stable_mosaic.version = 11 : i64} {
  func.func @_policy_kernel(%arg0: i32, %arg1: memref<128x6xf32, #tpu.memory_space<vmem>>, %arg2: memref<128x6xf32, #tpu.memory_space<vmem>>, %arg3: memref<128x1xf32, #tpu.memory_space<vmem>>, %arg4: memref<8x128xf32, #tpu.memory_space<vmem>>, %arg5: memref<8x1xf32, #tpu.memory_space<vmem>>, %arg6: memref<8x128xf32, #tpu.memory_space<vmem>>) attributes {dimension_semantics = [#tpu.dimension_semantics<parallel>], iteration_bounds = array<i64: 1>, scalar_prefetch = 0 : i64, scratch_operands = 0 : i64, tpu.core_type = #tpu.core_type<tc>, window_params = [{transform_indices = @transform_0, window_bounds = array<i64: 128, 6>}, {pipeline_mode = #tpu.pipeline_mode<synchronous>, transform_indices = @transform_1, window_bounds = array<i64: 128, 6>}, {pipeline_mode = #tpu.pipeline_mode<synchronous>, transform_indices = @transform_2, window_bounds = array<i64: 128, 1>}, {pipeline_mode = #tpu.pipeline_mode<synchronous>, transform_indices = @transform_3, window_bounds = array<i64: 8, 128>}, {pipeline_mode = #tpu.pipeline_mode<synchronous>, transform_indices = @transform_4, window_bounds = array<i64: 8, 1>}, {transform_indices = @transform_5, window_bounds = array<i64: 8, 128>}]} {
    %c0 = arith.constant 0 : index
    %c0_0 = arith.constant 0 : index
    %0 = vector.load %arg1[%c0, %c0_0] : memref<128x6xf32, #tpu.memory_space<vmem>>, vector<128x6xf32>
    %c0_1 = arith.constant 0 : index
    %c0_2 = arith.constant 0 : index
    %1 = vector.load %arg2[%c0_1, %c0_2] : memref<128x6xf32, #tpu.memory_space<vmem>>, vector<128x6xf32>
    %cst = arith.constant dense<0.000000e+00> : vector<128x128xf32>
    %2 = tpu.matmul %1, %0, %cst {dimension_numbers = #tpu.dot_dimension_numbers<[1], [1], [0], [0], [0, 0, 1, 0], [], []>} : vector<128x6xf32>, vector<128x6xf32>, vector<128x128xf32> -> vector<128x128xf32>
    %c0_3 = arith.constant 0 : index
    %c0_4 = arith.constant 0 : index
    %3 = vector.load %arg3[%c0_3, %c0_4] : memref<128x1xf32, #tpu.memory_space<vmem>>, vector<128x1xf32>
    %4 = vector.broadcast %3 : vector<128x1xf32> to vector<128x128xf32>
    %5 = arith.addf %2, %4 : vector<128x128xf32>
    %cst_5 = arith.constant 0.000000e+00 : f32
    %6 = vector.broadcast %cst_5 : f32 to vector<128x128xf32>
    %7 = arith.maximumf %5, %6 : vector<128x128xf32>
    %c0_6 = arith.constant 0 : index
    %c0_7 = arith.constant 0 : index
    %8 = vector.load %arg4[%c0_6, %c0_7] : memref<8x128xf32, #tpu.memory_space<vmem>>, vector<8x128xf32>
    %cst_8 = arith.constant dense<0.000000e+00> : vector<8x128xf32>
    %9 = tpu.matmul %8, %7, %cst_8 {dimension_numbers = #tpu.dot_dimension_numbers<[1], [0], [0], [1], [0, 0, 1, 1], [], []>} : vector<8x128xf32>, vector<128x128xf32>, vector<8x128xf32> -> vector<8x128xf32>
    %c0_9 = arith.constant 0 : index
    %c0_10 = arith.constant 0 : index
    %10 = vector.load %arg5[%c0_9, %c0_10] : memref<8x1xf32, #tpu.memory_space<vmem>>, vector<8x1xf32>
    %11 = vector.broadcast %10 : vector<8x1xf32> to vector<8x128xf32>
    %12 = arith.addf %9, %11 : vector<8x128xf32>
    %cst_11 = arith.constant dense<0xFF800000> : vector<128xf32>
    %13 = vector.multi_reduction <maximumf>, %12, %cst_11 [0] : vector<8x128xf32> to vector<128xf32>
    %14 = vector.shape_cast %13 : vector<128xf32> to vector<1x128xf32>
    %15 = vector.broadcast %14 : vector<1x128xf32> to vector<8x128xf32>
    %16 = arith.subf %12, %15 : vector<8x128xf32>
    %17 = math.exp %16 : vector<8x128xf32>
    %cst_12 = arith.constant dense<0.000000e+00> : vector<128xf32>
    %18 = vector.multi_reduction <add>, %17, %cst_12 [0] : vector<8x128xf32> to vector<128xf32>
    %19 = vector.shape_cast %18 : vector<128xf32> to vector<1x128xf32>
    %20 = vector.broadcast %19 : vector<1x128xf32> to vector<8x128xf32>
    %21 = arith.divf %17, %20 : vector<8x128xf32>
    %c0_13 = arith.constant 0 : index
    %c0_14 = arith.constant 0 : index
    %22 = vector.load %arg6[%c0_13, %c0_14] : memref<8x128xf32, #tpu.memory_space<vmem>>, vector<8x128xf32>
    tpu.vector_store %arg6[%c0_13, %c0_14], %21 {strides = array<i32>} : memref<8x128xf32, #tpu.memory_space<vmem>>, vector<8x128xf32>,
    return
  }
  func.func @transform_0(%arg0: i32) -> (i32, i32) {
    %c0_i32 = arith.constant 0 : i32
    %c0_i32_0 = arith.constant 0 : i32
    return %arg0, %c0_i32 : i32, i32
  }
  func.func @transform_1(%arg0: i32) -> (i32, i32) {
    %c0_i32 = arith.constant 0 : i32
    %c0_i32_0 = arith.constant 0 : i32
    %c0_i32_1 = arith.constant 0 : i32
    return %c0_i32, %c0_i32_0 : i32, i32
  }
  func.func @transform_2(%arg0: i32) -> (i32, i32) {
    %c0_i32 = arith.constant 0 : i32
    %c0_i32_0 = arith.constant 0 : i32
    %c0_i32_1 = arith.constant 0 : i32
    return %c0_i32, %c0_i32_0 : i32, i32
  }
  func.func @transform_3(%arg0: i32) -> (i32, i32) {
    %c0_i32 = arith.constant 0 : i32
    %c0_i32_0 = arith.constant 0 : i32
    %c0_i32_1 = arith.constant 0 : i32
    return %c0_i32, %c0_i32_0 : i32, i32
  }
  func.func @transform_4(%arg0: i32) -> (i32, i32) {
    %c0_i32 = arith.constant 0 : i32
    %c0_i32_0 = arith.constant 0 : i32
    %c0_i32_1 = arith.constant 0 : i32
    return %c0_i32, %c0_i32_0 : i32, i32
  }
  func.func @transform_5(%arg0: i32) -> (i32, i32) {
    %c0_i32 = arith.constant 0 : i32
    %c0_i32_0 = arith.constant 0 : i32
    return %c0_i32, %arg0 : i32, i32
  }
}

</mosaic_0001>

<bundles_post_ra>
// kernel: policy_forward.1
= control target key start
LH: loop header
LB: loop body
LE: loop exit
PB: predicated region body
PF: predicated region fallthrough
CT: control target
= control target key end

     0   :  { %vm148_vm0 = vcmask 48128   ;;  %v476_v10 = vmov 0   ;;  %s740_s0 = inlined_call_operand.vmem [shape: f32[2,6], index: 0, kind: input, shape index: {}]   ;;  %s741_s2 = inlined_call_operand.vmem [shape: f32[128,1], index: 2, kind: input, shape index: {}]   ;;  %s742_s1 = inlined_call_operand.vmem [shape: f32[128,6], index: 1, kind: input, shape index: {}]   ;;  %s743_s4 = inlined_call_operand.vmem [shape: f32[8,1], index: 4, kind: input, shape index: {}]   ;;  %s744_s3 = inlined_call_operand.vmem [shape: f32[8,128], index: 3, kind: input, shape index: {}]   ;;  %s745_s5 = inlined_call_operand.vmem [shape: f32[8,2], index: 5, kind: output, shape index: {}]  }
   0x1   :  { %v35_v0 = vld [vmem:[%s740_s0 + $0x78] sm:$0xff]  ;;  %v34_v1 = vld [vmem:[%s740_s0 + $0x70] sm:$0xff]  ;;  %v33_v2 = vld [vmem:[%s740_s0 + $0x68] sm:$0xff]  ;;  %469 = vset.pattern.permute.xlu0 %v476_v10  ;;  %470 = vset.pattern.permute.xlu1 %v476_v10 }
   0x2   :  { %422 = vmatpush.xpose.msk.msra.mxu3 %vm148_vm0, %v35_v0  ;;  %420 = vmatpush.xpose.msk.msra.mxu1 %vm148_vm0, %v35_v0  ;;  %v32_v3 = vld [vmem:[%s740_s0 + $0x60] sm:$0xff]  ;;  %v31_v4 = vld [vmem:[%s740_s0 + $0x58] sm:$0xff]  ;;  %v30_v5 = vld [vmem:[%s740_s0 + $0x50] sm:$0xff] }
   0x3   :  { %421 = vmatpush.xpose.msk.msra.mxu2 %vm148_vm0, %v35_v0  ;;  %388 = vmatpush.xpose.msk.msra.mxu0 %vm148_vm0, %v35_v0  ;;  %v29_v6 = vld [vmem:[%s740_s0 + $0x48] sm:$0xff]  ;;  %v28_v7 = vld [vmem:[%s740_s0 + $0x40] sm:$0xff]  ;;  %v67_v8 = vld [vmem:[%s741_s2 + $0x78] sm:$0xff] }
   0x4   :  { %v27_v9 = vld [vmem:[%s740_s0 + $0x38] sm:$0xff]  ;;  %145 = vperm.xlu0 %469, %v67_v8   ;;  %v65_v11 = vld [vmem:[%s741_s2 + $0x68] sm:$0xff]  ;;  %471 = vset.pattern.permute.xlu2 %v476_v10  ;;  %v26_v12 = vld [vmem:[%s740_s0 + $0x30] sm:$0xff] }
   0x5   :  { %135 = vperm.xlu1 %470, %v65_v11   ;;  %v66_v13 = vld [vmem:[%s741_s2 + $0x70] sm:$0xff]  ;;  %v25_v14 = vld [vmem:[%s740_s0 + $0x28] sm:$0xff]  ;;  %v64_v15 = vld [vmem:[%s741_s2 + $0x60] sm:$0xff] }
   0x6   :  { %425 = vmatpush.xpose.msk.msra.mxu3 %vm148_vm0, %v34_v1  ;;  %423 = vmatpush.xpose.msk.msra.mxu1 %vm148_vm0, %v34_v1  ;;  %v24_v16 = vld [vmem:[%s740_s0 + $0x20] sm:$0xff]  ;;  %v61_v17 = vld [vmem:[%s741_s2 + $0x48] sm:$0xff]  ;;  %v23_v18 = vld [vmem:[%s740_s0 + $0x18] sm:$0xff] }
   0x7   :  { %424 = vmatpush.xpose.msk.msra.mxu2 %vm148_vm0, %v34_v1  ;;  %389 = vmatpush.xpose.msk.msra.mxu0 %vm148_vm0, %v34_v1  ;;  %v60_v19 = vld [vmem:[%s741_s2 + $0x40] sm:$0xff]  ;;  %v22_v20 = vld [vmem:[%s740_s0 + $0x10] sm:$0xff]  ;;  %v21_v22 = vld [vmem:[%s740_s0 + $0x8] sm:$0xff] }
   0x8   :  { %v58_v21 = vld [vmem:[%s741_s2 + $0x30] sm:$0xff]  ;;  %v57_v23 = vld [vmem:[%s741_s2 + $0x28] sm:$0xff]  ;;  %v20_v24 = vld [vmem:[%s740_s0] sm:$0xff] }
   0x9   :  { %v47_v25 = vld [vmem:[%s742_s1 + $0x58] sm:$0xff]  ;;  %v36_v28 = vld [vmem:[%s742_s1] sm:$0xff]  ;;  %v54_v30 = vld [vmem:[%s741_s2 + $0x10] sm:$0xff] }
   0xa   :  { %428 = vmatpush.xpose.msk.msra.mxu3 %vm148_vm0, %v33_v2  ;;  %426 = vmatpush.xpose.msk.msra.mxu1 %vm148_vm0, %v33_v2  ;;  %v39_v26 = vld [vmem:[%s742_s1 + $0x18] sm:$0xff]  ;;  %v48_v32 = vld [vmem:[%s742_s1 + $0x60] sm:$0xff]  ;;  %v37_v35 = vld [vmem:[%s742_s1 + $0x8] sm:$0xff] }
   0xb   :  { %427 = vmatpush.xpose.msk.msra.mxu2 %vm148_vm0, %v33_v2  ;;  %390 = vmatpush.xpose.msk.msra.mxu0 %vm148_vm0, %v33_v2  ;;  %v43_v27 = vld [vmem:[%s742_s1 + $0x38] sm:$0xff]  ;;  %v40_v33 = vld [vmem:[%s742_s1 + $0x20] sm:$0xff]  ;;  %v62_v37 = vld [vmem:[%s741_s2 + $0x50] sm:$0xff] }
   0xc   :  { %140 = vperm.xlu0 %469, %v66_v13   ;;  %v55_v29 = vld [vmem:[%s741_s2 + $0x18] sm:$0xff]  ;;  %v44_v34 = vld [vmem:[%s742_s1 + $0x40] sm:$0xff]  ;;  %v49_v39 = vld [vmem:[%s742_s1 + $0x68] sm:$0xff] }
   0xd   :  { %130 = vperm.xlu1 %470, %v64_v15   ;;  %v63_v31 = vld [vmem:[%s741_s2 + $0x58] sm:$0xff]  ;;  %v52_v36 = vld [vmem:[%s741_s2] sm:$0xff]  ;;  %v41_v40 = vld [vmem:[%s742_s1 + $0x28] sm:$0xff] }
   0xe   :  { %431 = vmatpush.xpose.msk.msra.mxu3 %vm148_vm0, %v32_v3  ;;  %429 = vmatpush.xpose.msk.msra.mxu1 %vm148_vm0, %v32_v3  ;;  %v327_v38 = vld [vmem:[%s743_s4] sm:$0xff]  ;;  %v45_v41 = vld [vmem:[%s742_s1 + $0x48] sm:$0xff]  ;;  %v38_v42 = vld [vmem:[%s742_s1 + $0x10] sm:$0xff] }
   0xf   :  { %430 = vmatpush.xpose.msk.msra.mxu2 %vm148_vm0, %v32_v3  ;;  %391 = vmatpush.xpose.msk.msra.mxu0 %vm148_vm0, %v32_v3  ;;  %v59_v43 = vld [vmem:[%s741_s2 + $0x38] sm:$0xff]  ;;  %v50_v44 = vld [vmem:[%s742_s1 + $0x70] sm:$0xff]  ;;  %v56_v47 = vld [vmem:[%s741_s2 + $0x20] sm:$0xff] }
  0x10   :  { %125 = vperm.xlu2 %471, %v63_v31   ;;  %v42_v45 = vld [vmem:[%s742_s1 + $0x30] sm:$0xff]  ;;  %v51_v48 = vld [vmem:[%s742_s1 + $0x78] sm:$0xff]  ;;  %v53_v49 = vld [vmem:[%s741_s2 + $0x8] sm:$0xff] }
  0x11   :  { %v46_v46 = vld [vmem:[%s742_s1 + $0x50] sm:$0xff] }
  0x12   :  { %434 = vmatpush.xpose.msk.msra.mxu3 %vm148_vm0, %v31_v4  ;;  %432 = vmatpush.xpose.msk.msra.mxu1 %vm148_vm0, %v31_v4 }
  0x13   :  { %433 = vmatpush.xpose.msk.msra.mxu2 %vm148_vm0, %v31_v4  ;;  %392 = vmatpush.xpose.msk.msra.mxu0 %vm148_vm0, %v31_v4 }
  0x14   :  { %115 = vperm.xlu0 %469, %v61_v17  }
  0x15   :  { %110 = vperm.xlu1 %470, %v60_v19  }
  0x16   :  { %437 = vmatpush.xpose.msk.msra.mxu3 %vm148_vm0, %v30_v5  ;;  %435 = vmatpush.xpose.msk.msra.mxu1 %vm148_vm0, %v30_v5 }
  0x17   :  { %436 = vmatpush.xpose.msk.msra.mxu2 %vm148_vm0, %v30_v5  ;;  %393 = vmatpush.xpose.msk.msra.mxu0 %vm148_vm0, %v30_v5 }
  0x18   :  { %120 = vperm.xlu2 %471, %v62_v37  }
  0x1a   :  { %440 = vmatpush.xpose.msk.msra.mxu3 %vm148_vm0, %v29_v6  ;;  %438 = vmatpush.xpose.msk.msra.mxu1 %vm148_vm0, %v29_v6 }
  0x1b   :  { %439 = vmatpush.xpose.msk.msra.mxu2 %vm148_vm0, %v29_v6  ;;  %394 = vmatpush.xpose.msk.msra.mxu0 %vm148_vm0, %v29_v6 }
  0x1c   :  { %100 = vperm.xlu0 %469, %v58_v21  }
  0x1d   :  { %95 = vperm.xlu1 %470, %v57_v23  }
  0x1e   :  { %443 = vmatpush.xpose.msk.msra.mxu3 %vm148_vm0, %v28_v7  ;;  %441 = vmatpush.xpose.msk.msra.mxu1 %vm148_vm0, %v28_v7 }
  0x1f   :  { %442 = vmatpush.xpose.msk.msra.mxu2 %vm148_vm0, %v28_v7  ;;  %395 = vmatpush.xpose.msk.msra.mxu0 %vm148_vm0, %v28_v7 }
  0x20   :  { %105 = vperm.xlu2 %471, %v59_v43  }
  0x22   :  { %446 = vmatpush.xpose.msk.msra.mxu3 %vm148_vm0, %v27_v9  ;;  %444 = vmatpush.xpose.msk.msra.mxu1 %vm148_vm0, %v27_v9 }
  0x23   :  { %445 = vmatpush.xpose.msk.msra.mxu2 %vm148_vm0, %v27_v9  ;;  %396 = vmatpush.xpose.msk.msra.mxu0 %vm148_vm0, %v27_v9 }
  0x24   :  { %85 = vperm.xlu0 %469, %v55_v29  }
  0x25   :  { %80 = vperm.xlu1 %470, %v54_v30  }
  0x26   :  { %449 = vmatpush.xpose.msk.msra.mxu3 %vm148_vm0, %v26_v12  ;;  %447 = vmatpush.xpose.msk.msra.mxu1 %vm148_vm0, %v26_v12 }
  0x27   :  { %448 = vmatpush.xpose.msk.msra.mxu2 %vm148_vm0, %v26_v12  ;;  %397 = vmatpush.xpose.msk.msra.mxu0 %vm148_vm0, %v26_v12 }
  0x28   :  { %90 = vperm.xlu2 %471, %v56_v47  }
  0x2a   :  { %452 = vmatpush.xpose.msk.msra.mxu3 %vm148_vm0, %v25_v14  ;;  %450 = vmatpush.xpose.msk.msra.mxu1 %vm148_vm0, %v25_v14 }
  0x2b   :  { %451 = vmatpush.xpose.msk.msra.mxu2 %vm148_vm0, %v25_v14  ;;  %398 = vmatpush.xpose.msk.msra.mxu0 %vm148_vm0, %v25_v14 }
  0x2c   :  { %70 = vperm.xlu0 %469, %v52_v36  }
  0x2d   :  { %330 = vperm.xlu1 %470, %v327_v38  }
  0x2e   :  { %455 = vmatpush.xpose.msk.msra.mxu3 %vm148_vm0, %v24_v16  ;;  %453 = vmatpush.xpose.msk.msra.mxu1 %vm148_vm0, %v24_v16 }
  0x2f   :  { %454 = vmatpush.xpose.msk.msra.mxu2 %vm148_vm0, %v24_v16  ;;  %399 = vmatpush.xpose.msk.msra.mxu0 %vm148_vm0, %v24_v16 }
  0x30   :  { %75 = vperm.xlu2 %471, %v53_v49  }
  0x32   :  { %458 = vmatpush.xpose.msk.msra.mxu3 %vm148_vm0, %v23_v18  ;;  %456 = vmatpush.xpose.msk.msra.mxu1 %vm148_vm0, %v23_v18 }
  0x33   :  { %457 = vmatpush.xpose.msk.msra.mxu2 %vm148_vm0, %v23_v18  ;;  %400 = vmatpush.xpose.msk.msra.mxu0 %vm148_vm0, %v23_v18 }
  0x36   :  { %461 = vmatpush.xpose.msk.msra.mxu3 %vm148_vm0, %v22_v20  ;;  %459 = vmatpush.xpose.msk.msra.mxu1 %vm148_vm0, %v22_v20 }
  0x37   :  { %460 = vmatpush.xpose.msk.msra.mxu2 %vm148_vm0, %v22_v20  ;;  %401 = vmatpush.xpose.msk.msra.mxu0 %vm148_vm0, %v22_v20 }
  0x3a   :  { %464 = vmatpush.xpose.msk.msra.mxu3 %vm148_vm0, %v21_v22  ;;  %462 = vmatpush.xpose.msk.msra.mxu1 %vm148_vm0, %v21_v22 }
  0x3b   :  { %463 = vmatpush.xpose.msk.msra.mxu2 %vm148_vm0, %v21_v22  ;;  %402 = vmatpush.xpose.msk.msra.mxu0 %vm148_vm0, %v21_v22 }
  0x3e   :  { %467 = vmatpush.xpose.msk.msra.mxu3 %vm148_vm0, %v20_v24  ;;  %465 = vmatpush.xpose.msk.msra.mxu1 %vm148_vm0, %v20_v24 }
  0x3f   :  { %466 = vmatpush.xpose.msk.msra.mxu2 %vm148_vm0, %v20_v24  ;;  %403 = vmatpush.xpose.msk.msra.mxu0 %vm148_vm0, %v20_v24 }
  0x41   :  { %415 = vmatmul.msk.f32.vlgmr.msra.gmra.mxu3 %vm148_vm0, %v47_v25  ;;  %407 = vmatmul.msk.f32.vlgmr.msra.gmra.mxu1 %vm148_vm0, %v39_v26 }
  0x42   :  { %411 = vmatmul.msk.f32.vlgmr.msra.gmra.mxu2 %vm148_vm0, %v43_v27  ;;  %404 = vmatmul.msk.f32.vlgmr.msra.gmra.mxu0 %vm148_vm0, %v36_v28 }
  0x49   :  { %416 = vmatmul.msk.f32.gmra.mxu3 %vm148_vm0, %v48_v32  ;;  %408 = vmatmul.msk.f32.gmra.mxu1 %vm148_vm0, %v40_v33 }
  0x4a   :  { %412 = vmatmul.msk.f32.gmra.mxu2 %vm148_vm0, %v44_v34  ;;  %405 = vmatmul.msk.f32.gmra.mxu0 %vm148_vm0, %v37_v35 }
  0x51   :  { %417 = vmatmul.msk.f32.gmra.mxu3 %vm148_vm0, %v49_v39  ;;  %409 = vmatmul.msk.f32.gmra.mxu1 %vm148_vm0, %v41_v40 }
  0x52   :  { %413 = vmatmul.msk.f32.gmra.mxu2 %vm148_vm0, %v45_v41  ;;  %406 = vmatmul.msk.f32.gmra.mxu0 %vm148_vm0, %v38_v42 }
  0x59   :  { %418 = vmatmul.msk.f32.gmra.mxu3 %vm148_vm0, %v50_v44  ;;  %410 = vmatmul.msk.f32.gmra.mxu1 %vm148_vm0, %v42_v45 }
  0x5a   :  { %414 = vmatmul.msk.f32.gmra.mxu2 %vm148_vm0, %v46_v46 }
  0x61   :  { %419 = vmatmul.msk.f32.gmra.mxu3 %vm148_vm0, %v51_v48 }
  0x6a   :  { %v126_v55 = vpop.permute.xlu2 %125 }
  0x72   :  { %v121_v62 = vpop.permute.xlu2 %120 }
  0x76   :  { %v146_v51 = vpop.permute.xlu0 %145 }
  0x77   :  { %v136_v54 = vpop.permute.xlu1 %135 }
  0x7a   :  { %v106_v9 = vpop.permute.xlu2 %105 }
  0x7e   :  { %v141_v58 = vpop.permute.xlu0 %140 }
  0x7f   :  { %v131_v61 = vpop.permute.xlu1 %130 }
  0x82   :  { %v91_v25 = vpop.permute.xlu2 %90 }
  0x86   :  { %v116_v0 = vpop.permute.xlu0 %115 }
  0x87   :  { %v111_v6 = vpop.permute.xlu1 %110 }
  0x8a   :  { %v76_v40 = vpop.permute.xlu2 %75 }
  0x8e   :  { %v101_v13 = vpop.permute.xlu0 %100 }
  0x8f   :  { %v96_v22 = vpop.permute.xlu1 %95 }
  0x96   :  { %v86_v29 = vpop.permute.xlu0 %85 }
  0x97   :  { %v81_v39 = vpop.permute.xlu1 %80 }
  0x9e   :  { %v71_v43 = vpop.permute.xlu0 %70 }
  0xbe   :  { %v271_v56 = vpop.f32.mrf.mxu1 }
  0xbf   :  { %v262_v5 = vpop.f32.mrf.mxu0  ;;  %v272_v37 = vadd.f32 %v271_v56, %v86_v29 }
  0xc0   :  { %v263_v46 = vadd.f32 %v262_v5, %v71_v43 }
  0xc1   :  { %v313_v44 = vmax.f32 %v272_v37, 0.0 }
  0xc2   :  { %v310_v49 = vmax.f32 %v263_v46, 0.0 }
  0xc4   :  { %v295_v50 = vpop.f32.mrf.mxu3 }
  0xc5   :  { %v283_v52 = vpop.f32.mrf.mxu2  ;;  %v296_v15 = vadd.f32 %v295_v50, %v126_v55  ;;  %v326_v50 = vld [vmem:[%s744_s3] sm:$0xff] }
  0xc6   :  { %v274_v63 = vpop.f32.mrf.mxu1  ;;  %v284_v27 = vadd.f32 %v283_v52, %v106_v9 }
  0xc7   :  { %v321_v19 = vmax.f32 %v296_v15, 0.0  ;;  %v265_v21 = vpop.f32.mrf.mxu0  ;;  %v275_v34 = vadd.f32 %v274_v63, %v91_v25 }
  0xc8   :  { %v317_v32 = vmax.f32 %v284_v27, 0.0  ;;  %v266_v45 = vadd.f32 %v265_v21, %v76_v40 }
  0xc9   :  { %v314_v41 = vmax.f32 %v275_v34, 0.0 }
  0xca   :  { %v311_v48 = vmax.f32 %v266_v45, 0.0 }
  0xcc   :  { %v298_v53 = vpop.f32.mrf.mxu3 }
  0xcd   :  { %v286_v59 = vpop.f32.mrf.mxu2  ;;  %v299_v11 = vadd.f32 %v298_v53, %v131_v61 }
  0xce   :  { %v277_v10 = vpop.f32.mrf.mxu1  ;;  %v287_v23 = vadd.f32 %v286_v59, %v111_v6 }
  0xcf   :  { %v322_v17 = vmax.f32 %v299_v11, 0.0  ;;  %v278_v33 = vadd.f32 %v277_v10, %v96_v22  ;;  %v268_v36 = vpop.f32.mrf.mxu0 }
  0xd0   :  { %v318_v30 = vmax.f32 %v287_v23, 0.0  ;;  %v269_v42 = vadd.f32 %v268_v36, %v81_v39 }
  0xd1   :  { %v315_v38 = vmax.f32 %v278_v33, 0.0 }
  0xd2   :  { %v312_v47 = vmax.f32 %v269_v42, 0.0 }
  0xd4   :  { %v301_v57 = vpop.f32.mrf.mxu3 }
  0xd5   :  { %v289_v1 = vpop.f32.mrf.mxu2  ;;  %v302_v7 = vadd.f32 %v301_v57, %v136_v54 }
  0xd6   :  { %v290_v20 = vadd.f32 %v289_v1, %v116_v0  ;;  %v280_v26 = vpop.f32.mrf.mxu1 }
  0xd7   :  { %v323_v16 = vmax.f32 %v302_v7, 0.0  ;;  %v281_v31 = vadd.f32 %v280_v26, %v101_v13 }
  0xd8   :  { %v319_v28 = vmax.f32 %v290_v20, 0.0 }
  0xd9   :  { %v316_v35 = vmax.f32 %v281_v31, 0.0 }
  0xdc   :  { %v304_v60 = vpop.f32.mrf.mxu3 }
  0xdd   :  { %v305_v3 = vadd.f32 %v304_v60, %v141_v58  ;;  %v292_v14 = vpop.f32.mrf.mxu2 }
  0xde   :  { %v293_v18 = vadd.f32 %v292_v14, %v121_v62 }
  0xdf   :  { %v324_v12 = vmax.f32 %v305_v3, 0.0 }
  0xe0   :  { %v320_v24 = vmax.f32 %v293_v18, 0.0 }
  0xe4   :  { %v307_v2 = vpop.f32.mrf.mxu3 }
  0xe5   :  { %v308_v4 = vadd.f32 %v307_v2, %v146_v51  ;;  %v331_v51 = vpop.permute.xlu1 %330 }
  0xe7   :  { %v325_v8 = vmax.f32 %v308_v4, 0.0 }
  0xe9   :  { %333 = vmatpush.msrb.mxu1 %v325_v8 }
  0xeb   :  { %334 = vmatpush.msrb.mxu1 %v324_v12 }
  0xed   :  { %335 = vmatpush.msrb.mxu1 %v323_v16 }
  0xef   :  { %336 = vmatpush.msrb.mxu1 %v322_v17 }
  0xf1   :  { %337 = vmatpush.msrb.mxu1 %v321_v19 }
  0xf3   :  { %338 = vmatpush.msrb.mxu1 %v320_v24 }
  0xf5   :  { %339 = vmatpush.msrb.mxu1 %v319_v28 }
  0xf7   :  { %340 = vmatpush.msrb.mxu1 %v318_v30 }
  0xf9   :  { %341 = vmatpush.msrb.mxu1 %v317_v32 }
  0xfb   :  { %342 = vmatpush.msrb.mxu1 %v316_v35 }
  0xfd   :  { %343 = vmatpush.msrb.mxu1 %v315_v38 }
  0xff   :  { %344 = vmatpush.msrb.mxu1 %v314_v41 }
 0x101   :  { %345 = vmatpush.msrb.mxu1 %v313_v44 }
 0x103   :  { %346 = vmatpush.msrb.mxu1 %v312_v47 }
 0x105   :  { %347 = vmatpush.msrb.mxu1 %v311_v48 }
 0x107   :  { %348 = vmatpush.msrb.mxu1 %v310_v49 }
 0x108   :  { %349 = vmatmul.f32.vlgmr.msrb.gmra.mxu1 %v326_v50 }
 0x185   :  { %v350_v52 = vpop.f32.mrf.mxu1 }
 0x186   :  { %v351_v53 = vadd.f32 %v350_v52, %v331_v51 }
 0x188   :  { %v353_v54 = vrot.slane %v351_v53, 4 }
 0x18a   :  { %v354_v55 = vmax.f32 %v351_v53, %v353_v54 }
 0x18c   :  { %v355_v56 = vrot.slane %v354_v55, 2 }
 0x18e   :  { %v356_v57 = vmax.f32 %v354_v55, %v355_v56 }
 0x190   :  { %v357_v58 = vrot.slane %v356_v57, 1 }
 0x192   :  { %v358_v59 = vmax.f32 %v356_v57, %v357_v58 }
 0x194   :  { %v359_v60 = vsub.f32 %v351_v53, %v358_v59 }
 0x196   :  { %v360_v61 = vmul.f32 1.442695, %v359_v60 }
 0x198   :  { %472 = vpow2.f32 %v360_v61 }
 0x19e   :  { %v473_v62 = vpop.eup %472 }
 0x19f   :  { %v362_v63 = vrot.slane %v473_v62, 4 }
 0x1a1   :  { %v363_v0 = vadd.f32 %v473_v62, %v362_v63 }
 0x1a3   :  { %v364_v1 = vrot.slane %v363_v0, 2 }
 0x1a5   :  { %v365_v2 = vadd.f32 %v364_v1, %v363_v0 }
 0x1a7   :  { %v366_v3 = vrot.slane %v365_v2, 1 }
 0x1a9   :  { %v367_v4 = vadd.f32 %v366_v3, %v365_v2 }
 0x1ab   :  { %474 = vrcp.f32 %v367_v4  ;;  %v379_v8 = vand.u32 2147483648, %v367_v4  ;;  %v377_v10 = vand.u32 2147483647, %v367_v4  ;;  %vm373_vm2 = vweird.f32 %v367_v4 }
 0x1ad   :  { %v380_v12 = vor.u32 1.1754944e-38, %v379_v8  ;;  %vm378_vm4 = vcmp.eq.f32.partialorder %v377_v10, 8.507059e+37 }
 0x1b1   :  { %v475_v5 = vpop.eup %474 }
 0x1b2   :  { %v369_v6 = vmul.f32 %v475_v5, %v367_v4  ;;  %vm374_vm1 = vweird.f32 %v475_v5 }
 0x1b3   :  { %vm375_vm3 = vmor %vm373_vm2, %vm374_vm1 }
 0x1b4   :  { %v370_v7 = vsub.f32 1.0, %v369_v6 }
 0x1b6   :  { %v371_v9 = vmul.f32 %v475_v5, %v370_v7 }
 0x1b8   :  { %v372_v11 = vadd.f32 %v475_v5, %v371_v9 }
 0x1ba   :  { %v376_v13 = vsel %vm375_vm3, %v475_v5, %v372_v11 }
 0x1bb   :  { %v381_v14 = vsel %vm378_vm4, %v380_v12, %v376_v13 }
 0x1bc   :  { %v382_v15 = vmul.f32 %v473_v62, %v381_v14 }
 0x1be   :  { %383 = vst [vmem:[%s745_s5] sm:$0xff] %v382_v15 }

</bundles_post_ra>
